<compile_context>
chip_gen: v5e
topology: v5e:2x2
jax: 0.10.0
libtpu: 0.0.40
codegen_flags: <defaults>
</compile_context>

<pallas_src>
import jax
import jax.numpy as jnp
import numpy as np
from jax.experimental import pallas as pl
from jax.experimental.pallas import tpu as pltpu


HP = 128           # padded hidden / per-gate lane-block width (one full lane tile)
GP = 3 * HP        # r | z | n gate blocks stacked along lanes


# ---------------------------------------------------------------------------
# Pallas kernel: T forward steps of LM (eval mode), state carried in VMEM.
# ---------------------------------------------------------------------------
def lm_seq_kernel(tok_ref,         # SMEM [T, B] int32   (scalar prefetch: token ids)
                  gx_tok_tbl_ref,  # VMEM [V, GP] f32    embed∘blend∘W_ih folded table (resident)
                  gx_base_ref,     # VMEM [B, GP] f32    gender contribution + fused input bias (resident)
                  pos_blk_ref,     # VMEM [1, 1, GP] f32 pos_val[t] * pos_gate  (per-step block)
                  state0_ref,      # VMEM [B, HP] f32    initial hidden state (padded, resident)
                  w_h_ref,         # VMEM [HP, GP] bf16  W_hh gate-stacked + lane/row padded (resident)
                  b_h_ref,         # VMEM [1, GP] f32    hidden-side bias (resident)
                  w_ans_ref,       # VMEM [HP, V] bf16   answer Linear weight, row padded (resident)
                  b_ans_ref,       # VMEM [1, V] f32
                  logp_ref,        # out  [1, B, V] f32  per-step log_softmax block
                  state_ref,       # out  [B, HP] f32    VMEM-resident carried GRU state
                  gx_scr):         # scratch VMEM [B, GP] f32 : gathered input-side gate rows
    b_sz, hp = state_ref.shape
    t = pl.program_id(0)

    @pl.when(t == 0)
    def _():
        state_ref[...] = state0_ref[...]   # seed the resident state from the input

    # In-kernel embedding gather: one dynamic row load per batch element from
    # the VMEM-resident folded table (token -> full input-side pre-activation).
    for b in range(b_sz):
        gx_scr[pl.ds(b, 1), :] = gx_tok_tbl_ref[pl.ds(tok_ref[t, b], 1), :]

    h = state_ref[...]                                                  # [B, HP] f32

    # Input-side gate pre-activations: gathered token rows + position block
    # + (gender + fused bias) block.  Exact fold of blend/position Linears.
    gx = gx_scr[...] + pos_blk_ref[0] + gx_base_ref[...]                # [B, GP]
    # Hidden-side gate pre-activations (bias must stay on this side for the n gate).
    gh = jnp.dot(h.astype(jnp.bfloat16), w_h_ref[...],
                 preferred_element_type=jnp.float32) + b_h_ref[...]     # [B, GP]

    # PyTorch nn.GRUCell semantics, gate order (r, z, n); 128-lane-aligned slices.
    r = jax.nn.sigmoid(gx[:, 0 * hp:1 * hp] + gh[:, 0 * hp:1 * hp])
    z = jax.nn.sigmoid(gx[:, 1 * hp:2 * hp] + gh[:, 1 * hp:2 * hp])
    n = jnp.tanh(gx[:, 2 * hp:3 * hp] + r * gh[:, 2 * hp:3 * hp])
    h_new = (1.0 - z) * n + z * h            # padded lanes stay exactly zero
    # TODO(synk): nn.Dropout(0.1) on the new state is identity in eval mode;
    # training-mode dropout is omitted.
    state_ref[...] = h_new

    # answer Linear + numerically-stable log_softmax over the vocab (lane axis).
    logits = jnp.dot(h_new.astype(jnp.bfloat16), w_ans_ref[...],
                     preferred_element_type=jnp.float32) + b_ans_ref[...]   # [B, V]
    m = jnp.max(logits, axis=-1, keepdims=True)
    lse = m + jnp.log(jnp.sum(jnp.exp(logits - m), axis=-1, keepdims=True))
    logp_ref[0, :, :] = logits - lse


# ---------------------------------------------------------------------------
# One-time parameter packing (exact, step/batch-invariant weight fusion).
# ---------------------------------------------------------------------------
def pack_params(params):
    E = params["w_ih"].shape[1]
    H = params["w_hh"].shape[1]
    V = params["w_ans"].shape[1]
    assert H <= HP, "hidden size must fit one padded 128-lane gate block"

    def gate_pad(ws):
        # ws: [3, in_dim, H] -> [in_dim, GP], gate g in lanes [g*HP, g*HP+H), rest 0
        in_dim = ws.shape[1]
        out = jnp.zeros((in_dim, GP), jnp.float32)
        for g in range(3):
            out = out.at[:, g * HP:g * HP + H].set(ws[g].astype(jnp.float32))
        return out

    w_ih_stk = gate_pad(params["w_ih"])     # [E, GP]
    b_ih_stk = gate_pad(params["b_ih"])     # [1, GP]
    w_hh_stk = gate_pad(params["w_hh"])     # [H, GP]
    b_hh_stk = gate_pad(params["b_hh"])     # [1, GP]
    w_hh_pad = jnp.zeros((HP, GP), jnp.float32).at[:H, :].set(w_hh_stk)   # [HP, GP]

    wb_in = params["w_blend"][0]            # [E, E]  input-emb chunk of blend Linear
    wb_gen = params["w_blend"][1]           # [E, E]  gender-emb chunk
    wb_pos = params["w_blend"][2]           # [E, E]  position chunk

    # Fold embedding tables, blend Linear and position Linear all the way
    # through W_ih (everything upstream of the GRU nonlinearity is linear):
    #   gx = gx_tok_table[token] + gx_gen_table[gender] + pos_val*pos_gate + b_x
    gx_tok_table = (params["embed"] @ wb_in) @ w_ih_stk            # [V, GP]
    gx_gen_table = (params["gender_embed"] @ wb_gen) @ w_ih_stk    # [GV, GP]
    pos_gate = (params["w_pos"] @ wb_pos) @ w_ih_stk               # [1, GP]
    b_x = (params["b_pos"] @ wb_pos + params["b_blend"]) @ w_ih_stk + b_ih_stk  # [1, GP]

    w_ans_pad = jnp.zeros((HP, V), jnp.float32).at[:H, :].set(params["w_ans"])

    return {
        "gx_tok_table": gx_tok_table.astype(jnp.float32),
        "gx_gen_table": gx_gen_table.astype(jnp.float32),
        "pos_gate": pos_gate.astype(jnp.float32),
        "b_x": b_x.astype(jnp.float32),
        "w_h": w_hh_pad.astype(jnp.bfloat16),
        "b_h": b_hh_stk.astype(jnp.float32),
        "w_ans": w_ans_pad.astype(jnp.bfloat16),
        "b_ans": params["b_ans"].astype(jnp.float32),
        "position_range": params["position_range"].astype(jnp.float32),
    }


# ---------------------------------------------------------------------------
# Wrapper: one pallas_call for the whole sequence.
# ---------------------------------------------------------------------------
def lm_forward_seq(packed, gender, pos_idx, tokens, state0):
    T, B = tokens.shape
    Hp, Gp = packed["w_h"].shape
    V = packed["w_ans"].shape[-1]
    H = state0.shape[-1]

    # Step-invariant / whole-sequence glue, done ONCE (not per step):
    gx_base = packed["gx_gen_table"][gender] + packed["b_x"]                 # [B, GP]
    pos_vals = packed["position_range"][pos_idx, 0]                          # [T]
    pos_blk = (pos_vals[:, None] * packed["pos_gate"])[:, None, :]           # [T, 1, GP]
    state0_pad = jnp.zeros((B, Hp), jnp.float32).at[:, :H].set(state0)       # [B, HP]

    const = lambda t, tok: (0, 0)   # resident-in-VMEM operands (index never changes)
    grid_spec = pltpu.PrefetchScalarGridSpec(
        num_scalar_prefetch=1,                      # token ids -> SMEM before the grid
        grid=(T,),
        in_specs=[
            pl.BlockSpec((V, Gp), const),                        # folded token table (resident)
            pl.BlockSpec((B, Gp), const),                        # gender + bias      (resident)
            pl.BlockSpec((1, 1, Gp), lambda t, tok: (t, 0, 0)),  # position block     (per step)
            pl.BlockSpec((B, Hp), const),                        # initial state      (resident)
            pl.BlockSpec((Hp, Gp), const),                       # W_hh bf16          (resident)
            pl.BlockSpec((1, Gp), const),                        # b_hh               (resident)
            pl.BlockSpec((Hp, V), const),                        # answer W bf16      (resident)
            pl.BlockSpec((1, V), const),                         # answer b           (resident)
        ],
        out_specs=(
            pl.BlockSpec((1, B, V), lambda t, tok: (t, 0, 0)),   # per-step logp (lane dense)
            pl.BlockSpec((B, Hp), const),                        # carried / final state
        ),
        scratch_shapes=[pltpu.VMEM((B, Gp), jnp.float32)],
    )

    logp, state_pad = pl.pallas_call(
        lm_seq_kernel,
        out_shape=(jax.ShapeDtypeStruct((T, B, V), jnp.float32),
                   jax.ShapeDtypeStruct((B, Hp), jnp.float32)),
        grid_spec=grid_spec,
        compiler_params=pltpu.CompilerParams(
            # time axis is a recurrence -> "arbitrary"; on v7x a parallel
            # batch/sequence axis would be added here to use both TensorCores.
            dimension_semantics=("arbitrary",)),
    )(tokens.astype(jnp.int32),
      packed["gx_tok_table"], gx_base, pos_blk, state0_pad,
      packed["w_h"], packed["b_h"], packed["w_ans"], packed["b_ans"])

    return logp, state_pad[:, :H]


# ---------------------------------------------------------------------------
# Pure-JAX f32 reference (un-fused, mirrors the PyTorch module step by step).
# ---------------------------------------------------------------------------
def lm_forward_seq_ref(params, gender, pos_idx, tokens, state0):
    T = tokens.shape[0]
    state = state0
    logps = []
    for t in range(T):
        in_emb = params["embed"][tokens[t]]
        g_emb = params["gender_embed"][gender]
        pos_val = params["position_range"][pos_idx[t]]                  # [1]
        pos_emb = pos_val * params["w_pos"] + params["b_pos"]           # [1, E]
        emb = (in_emb @ params["w_blend"][0] + g_emb @ params["w_blend"][1]
               + pos_emb @ params["w_blend"][2] + params["b_blend"])
        h = state
        i_r = emb @ params["w_ih"][0] + params["b_ih"][0]
        i_z = emb @ params["w_ih"][1] + params["b_ih"][1]
        i_n = emb @ params["w_ih"][2] + params["b_ih"][2]
        h_r = h @ params["w_hh"][0] + params["b_hh"][0]
        h_z = h @ params["w_hh"][1] + params["b_hh"][1]
        h_n = h @ params["w_hh"][2] + params["b_hh"][2]
        r = jax.nn.sigmoid(i_r + h_r)
        z = jax.nn.sigmoid(i_z + h_z)
        n = jnp.tanh(i_n + r * h_n)
        state = (1.0 - z) * n + z * h
        logits = state @ params["w_ans"] + params["b_ans"]
        logps.append(jax.nn.log_softmax(logits, axis=-1))
    return jnp.stack(logps), state


def init_params(key, vocab_size, gender_vocab_size, embed_size, hidden_size):
    ks = jax.random.split(key, 12)
    s = 0.1
    V, GV, E, H = vocab_size, gender_vocab_size, embed_size, hidden_size
    return {
        "embed":          s * jax.random.normal(ks[0], (V, E), jnp.float32),
        "gender_embed":   s * jax.random.normal(ks[1], (GV, E), jnp.float32),
        # position Linear(1, E): stored input-major [1, E] + bias [1, E]
        "w_pos":          s * jax.random.normal(ks[2], (1, E), jnp.float32),
        "b_pos":          s * jax.random.normal(ks[3], (1, E), jnp.float32),
        # blend Linear(3E, E): three [E, E] chunks (input-major) + bias
        "w_blend":        s * jax.random.normal(ks[4], (3, E, E), jnp.float32),
        "b_blend":        s * jax.random.normal(ks[5], (1, E), jnp.float32),
        # GRUCell: W_ih [3,E,H], W_hh [3,H,H] (gate order r, z, n), biases [3,1,H]
        "w_ih":           s * jax.random.normal(ks[6], (3, E, H), jnp.float32),
        "b_ih":           s * jax.random.normal(ks[7], (3, 1, H), jnp.float32),
        "w_hh":           s * jax.random.normal(ks[8], (3, H, H), jnp.float32),
        "b_hh":           s * jax.random.normal(ks[9], (3, 1, H), jnp.float32),
        # answer Linear(H, V): [H, V] (input-major) + bias [1, V]
        "w_ans":          s * jax.random.normal(ks[10], (H, V), jnp.float32),
        "b_ans":          s * jax.random.normal(ks[11], (1, V), jnp.float32),
        # self.position_range = arange(0, 100).unsqueeze(1).float()  -> [100, 1]
        "position_range": jnp.arange(0, 100, dtype=jnp.float32)[:, None],
    }


if __name__ == "__main__":
    B, E, H, V, GV, T = 8, 32, 32, 256, 4, 12

    key = jax.random.PRNGKey(0)
    kp, kg, ki = jax.random.split(key, 3)
    params = init_params(kp, V, GV, E, H)
    packed = pack_params(params)   # one-time, step-invariant weight fusion

    gender = jax.random.randint(kg, (B,), 0, GV, dtype=jnp.int32)        # [B]
    tokens = jax.random.randint(ki, (T, B), 0, V, dtype=jnp.int32)       # [T, B]
    # positions as in LM.do_train: LongVar(np.linspace(0, 1, seq)) -> int indices
    pos_idx = jnp.asarray(np.linspace(0, 1, T), dtype=jnp.int32)         # [T]
    state0 = jnp.zeros((B, H), jnp.float32)                              # initial_hidden

    logp, final_state = jax.jit(lm_forward_seq)(packed, gender, pos_idx, tokens, state0)
    jax.block_until_ready((logp, final_state))

    # sanity 1: every log_softmax row exponentiates to a probability distribution
    row_sums = np.asarray(jnp.sum(jnp.exp(logp), axis=-1))
    assert logp.shape == (T, B, V) and final_state.shape == (B, H)
    assert np.allclose(row_sums, 1.0, atol=1e-3), row_sums

    # sanity 2: fused bf16-weight sequence kernel matches the un-fused f32
    #           per-step reference over the FULL recurrence (not one step)
    logp_ref, state_ref_ = lm_forward_seq_ref(params, gender, pos_idx, tokens, state0)
    assert np.allclose(np.asarray(logp), np.asarray(logp_ref), atol=5e-2), \
        np.max(np.abs(np.asarray(logp) - np.asarray(logp_ref)))
    assert np.allclose(np.asarray(final_state), np.asarray(state_ref_), atol=5e-2), \
        np.max(np.abs(np.asarray(final_state) - np.asarray(state_ref_)))

    print("KERNEL_OK")
</pallas_src>

<mosaic_0001>
module attributes {stable_mosaic.version = 11 : i64} {
  func.func @lm_seq_kernel(%arg0: i32, %arg1: memref<12x8xi32, #tpu.memory_space<smem>>, %arg2: memref<256x384xf32, #tpu.memory_space<vmem>>, %arg3: memref<8x384xf32, #tpu.memory_space<vmem>>, %arg4: memref<1x1x384xf32, #tpu.memory_space<vmem>>, %arg5: memref<8x128xf32, #tpu.memory_space<vmem>>, %arg6: memref<128x384xbf16, #tpu.memory_space<vmem>>, %arg7: memref<1x384xf32, #tpu.memory_space<vmem>>, %arg8: memref<128x256xbf16, #tpu.memory_space<vmem>>, %arg9: memref<1x256xf32, #tpu.memory_space<vmem>>, %arg10: memref<1x8x256xf32, #tpu.memory_space<vmem>>, %arg11: memref<8x128xf32, #tpu.memory_space<vmem>>, %arg12: memref<8x384xf32, #tpu.memory_space<vmem>>) attributes {dimension_semantics = [#tpu.dimension_semantics<arbitrary>], iteration_bounds = array<i64: 12>, scalar_prefetch = 1 : i64, scratch_operands = 1 : i64, tpu.core_type = #tpu.core_type<tc>, window_params = [{pipeline_mode = #tpu.pipeline_mode<synchronous>, transform_indices = @transform_0, window_bounds = array<i64: 256, 384>}, {pipeline_mode = #tpu.pipeline_mode<synchronous>, transform_indices = @transform_1, window_bounds = array<i64: 8, 384>}, {transform_indices = @transform_2, window_bounds = array<i64: 1, 1, 384>}, {pipeline_mode = #tpu.pipeline_mode<synchronous>, transform_indices = @transform_3, window_bounds = array<i64: 8, 128>}, {pipeline_mode = #tpu.pipeline_mode<synchronous>, transform_indices = @transform_4, window_bounds = array<i64: 128, 384>}, {pipeline_mode = #tpu.pipeline_mode<synchronous>, transform_indices = @transform_5, window_bounds = array<i64: 1, 384>}, {pipeline_mode = #tpu.pipeline_mode<synchronous>, transform_indices = @transform_6, window_bounds = array<i64: 128, 256>}, {pipeline_mode = #tpu.pipeline_mode<synchronous>, transform_indices = @transform_7, window_bounds = array<i64: 1, 256>}, {transform_indices = @transform_8, window_bounds = array<i64: 1, 8, 256>}, {pipeline_mode = #tpu.pipeline_mode<synchronous>, transform_indices = @transform_9, window_bounds = array<i64: 8, 128>}]} {
    %c0_i32 = arith.constant 0 : i32
    %0 = arith.cmpi eq, %arg0, %c0_i32 : i32
    %1 = arith.extui %0 : i1 to i32
    %c0_i32_0 = arith.constant 0 : i32
    %2 = arith.cmpi ne, %1, %c0_i32_0 : i32
    scf.if %2 {
      %c0_53 = arith.constant 0 : index
      %c0_54 = arith.constant 0 : index
      %104 = vector.load %arg5[%c0_53, %c0_54] : memref<8x128xf32, #tpu.memory_space<vmem>>, vector<8x128xf32>
      %c0_55 = arith.constant 0 : index
      %c0_56 = arith.constant 0 : index
      %105 = vector.load %arg11[%c0_55, %c0_56] : memref<8x128xf32, #tpu.memory_space<vmem>>, vector<8x128xf32>
      tpu.vector_store %arg11[%c0_55, %c0_56], %104 {strides = array<i32>} : memref<8x128xf32, #tpu.memory_space<vmem>>, vector<8x128xf32>,
    } else {
    }
    %3 = arith.index_cast %arg0 : i32 to index
    %c0 = arith.constant 0 : index
    %4 = memref.load %arg1[%3, %c0] : memref<12x8xi32, #tpu.memory_space<smem>>
    %5 = arith.index_cast %4 : i32 to index
    %c0_1 = arith.constant 0 : index
    %6 = vector.load %arg2[%5, %c0_1] : memref<256x384xf32, #tpu.memory_space<vmem>>, vector<1x384xf32>
    %c0_2 = arith.constant 0 : index
    %c0_3 = arith.constant 0 : index
    %7 = vector.load %arg12[%c0_2, %c0_3] : memref<8x384xf32, #tpu.memory_space<vmem>>, vector<1x384xf32>
    tpu.vector_store %arg12[%c0_2, %c0_3], %6 {strides = array<i32>} : memref<8x384xf32, #tpu.memory_space<vmem>>, vector<1x384xf32>,
    %8 = arith.index_cast %arg0 : i32 to index
    %c1 = arith.constant 1 : index
    %9 = memref.load %arg1[%8, %c1] : memref<12x8xi32, #tpu.memory_space<smem>>
    %10 = arith.index_cast %9 : i32 to index
    %c0_4 = arith.constant 0 : index
    %11 = vector.load %arg2[%10, %c0_4] : memref<256x384xf32, #tpu.memory_space<vmem>>, vector<1x384xf32>
    %c1_5 = arith.constant 1 : index
    %c0_6 = arith.constant 0 : index
    %12 = vector.load %arg12[%c1_5, %c0_6] : memref<8x384xf32, #tpu.memory_space<vmem>>, vector<1x384xf32>
    tpu.vector_store %arg12[%c1_5, %c0_6], %11 {strides = array<i32>} : memref<8x384xf32, #tpu.memory_space<vmem>>, vector<1x384xf32>,
    %13 = arith.index_cast %arg0 : i32 to index
    %c2 = arith.constant 2 : index
    %14 = memref.load %arg1[%13, %c2] : memref<12x8xi32, #tpu.memory_space<smem>>
    %15 = arith.index_cast %14 : i32 to index
    %c0_7 = arith.constant 0 : index
    %16 = vector.load %arg2[%15, %c0_7] : memref<256x384xf32, #tpu.memory_space<vmem>>, vector<1x384xf32>
    %c2_8 = arith.constant 2 : index
    %c0_9 = arith.constant 0 : index
    %17 = vector.load %arg12[%c2_8, %c0_9] : memref<8x384xf32, #tpu.memory_space<vmem>>, vector<1x384xf32>
    tpu.vector_store %arg12[%c2_8, %c0_9], %16 {strides = array<i32>} : memref<8x384xf32, #tpu.memory_space<vmem>>, vector<1x384xf32>,
    %18 = arith.index_cast %arg0 : i32 to index
    %c3 = arith.constant 3 : index
    %19 = memref.load %arg1[%18, %c3] : memref<12x8xi32, #tpu.memory_space<smem>>
    %20 = arith.index_cast %19 : i32 to index
    %c0_10 = arith.constant 0 : index
    %21 = vector.load %arg2[%20, %c0_10] : memref<256x384xf32, #tpu.memory_space<vmem>>, vector<1x384xf32>
    %c3_11 = arith.constant 3 : index
    %c0_12 = arith.constant 0 : index
    %22 = vector.load %arg12[%c3_11, %c0_12] : memref<8x384xf32, #tpu.memory_space<vmem>>, vector<1x384xf32>
    tpu.vector_store %arg12[%c3_11, %c0_12], %21 {strides = array<i32>} : memref<8x384xf32, #tpu.memory_space<vmem>>, vector<1x384xf32>,
    %23 = arith.index_cast %arg0 : i32 to index
    %c4 = arith.constant 4 : index
    %24 = memref.load %arg1[%23, %c4] : memref<12x8xi32, #tpu.memory_space<smem>>
    %25 = arith.index_cast %24 : i32 to index
    %c0_13 = arith.constant 0 : index
    %26 = vector.load %arg2[%25, %c0_13] : memref<256x384xf32, #tpu.memory_space<vmem>>, vector<1x384xf32>
    %c4_14 = arith.constant 4 : index
    %c0_15 = arith.constant 0 : index
    %27 = vector.load %arg12[%c4_14, %c0_15] : memref<8x384xf32, #tpu.memory_space<vmem>>, vector<1x384xf32>
    tpu.vector_store %arg12[%c4_14, %c0_15], %26 {strides = array<i32>} : memref<8x384xf32, #tpu.memory_space<vmem>>, vector<1x384xf32>,
    %28 = arith.index_cast %arg0 : i32 to index
    %c5 = arith.constant 5 : index
    %29 = memref.load %arg1[%28, %c5] : memref<12x8xi32, #tpu.memory_space<smem>>
    %30 = arith.index_cast %29 : i32 to index
    %c0_16 = arith.constant 0 : index
    %31 = vector.load %arg2[%30, %c0_16] : memref<256x384xf32, #tpu.memory_space<vmem>>, vector<1x384xf32>
    %c5_17 = arith.constant 5 : index
    %c0_18 = arith.constant 0 : index
    %32 = vector.load %arg12[%c5_17, %c0_18] : memref<8x384xf32, #tpu.memory_space<vmem>>, vector<1x384xf32>
    tpu.vector_store %arg12[%c5_17, %c0_18], %31 {strides = array<i32>} : memref<8x384xf32, #tpu.memory_space<vmem>>, vector<1x384xf32>,
    %33 = arith.index_cast %arg0 : i32 to index
    %c6 = arith.constant 6 : index
    %34 = memref.load %arg1[%33, %c6] : memref<12x8xi32, #tpu.memory_space<smem>>
    %35 = arith.index_cast %34 : i32 to index
    %c0_19 = arith.constant 0 : index
    %36 = vector.load %arg2[%35, %c0_19] : memref<256x384xf32, #tpu.memory_space<vmem>>, vector<1x384xf32>
    %c6_20 = arith.constant 6 : index
    %c0_21 = arith.constant 0 : index
    %37 = vector.load %arg12[%c6_20, %c0_21] : memref<8x384xf32, #tpu.memory_space<vmem>>, vector<1x384xf32>
    tpu.vector_store %arg12[%c6_20, %c0_21], %36 {strides = array<i32>} : memref<8x384xf32, #tpu.memory_space<vmem>>, vector<1x384xf32>,
    %38 = arith.index_cast %arg0 : i32 to index
    %c7 = arith.constant 7 : index
    %39 = memref.load %arg1[%38, %c7] : memref<12x8xi32, #tpu.memory_space<smem>>
    %40 = arith.index_cast %39 : i32 to index
    %c0_22 = arith.constant 0 : index
    %41 = vector.load %arg2[%40, %c0_22] : memref<256x384xf32, #tpu.memory_space<vmem>>, vector<1x384xf32>
    %c7_23 = arith.constant 7 : index
    %c0_24 = arith.constant 0 : index
    %42 = vector.load %arg12[%c7_23, %c0_24] : memref<8x384xf32, #tpu.memory_space<vmem>>, vector<1x384xf32>
    tpu.vector_store %arg12[%c7_23, %c0_24], %41 {strides = array<i32>} : memref<8x384xf32, #tpu.memory_space<vmem>>, vector<1x384xf32>,
    %c0_25 = arith.constant 0 : index
    %c0_26 = arith.constant 0 : index
    %43 = vector.load %arg11[%c0_25, %c0_26] : memref<8x128xf32, #tpu.memory_space<vmem>>, vector<8x128xf32>
    %c0_27 = arith.constant 0 : index
    %c0_28 = arith.constant 0 : index
    %44 = vector.load %arg12[%c0_27, %c0_28] : memref<8x384xf32, #tpu.memory_space<vmem>>, vector<8x384xf32>
    %c0_29 = arith.constant 0 : index
    %c0_30 = arith.constant 0 : index
    %c0_31 = arith.constant 0 : index
    %45 = vector.load %arg4[%c0_29, %c0_30, %c0_31] : memref<1x1x384xf32, #tpu.memory_space<vmem>>, vector<1x1x384xf32>
    %46 = vector.shape_cast %45 : vector<1x1x384xf32> to vector<1x384xf32>
    %47 = vector.broadcast %46 : vector<1x384xf32> to vector<8x384xf32>
    %48 = arith.addf %44, %47 : vector<8x384xf32>
    %c0_32 = arith.constant 0 : index
    %c0_33 = arith.constant 0 : index
    %49 = vector.load %arg3[%c0_32, %c0_33] : memref<8x384xf32, #tpu.memory_space<vmem>>, vector<8x384xf32>
    %50 = arith.addf %48, %49 : vector<8x384xf32>
    %51 = arith.truncf %43 : vector<8x128xf32> to vector<8x128xbf16>
    %c0_34 = arith.constant 0 : index
    %c0_35 = arith.constant 0 : index
    %52 = vector.load %arg6[%c0_34, %c0_35] : memref<128x384xbf16, #tpu.memory_space<vmem>>, vector<128x384xbf16>
    %cst = arith.constant dense<0.000000e+00> : vector<8x384xf32>
    %53 = tpu.matmul %51, %52, %cst {dimension_numbers = #tpu.dot_dimension_numbers<[1], [0], [0], [1], [0, 0, 1, 1], [], []>} : vector<8x128xbf16>, vector<128x384xbf16>, vector<8x384xf32> -> vector<8x384xf32>
    %c0_36 = arith.constant 0 : index
    %c0_37 = arith.constant 0 : index
    %54 = vector.load %arg7[%c0_36, %c0_37] : memref<1x384xf32, #tpu.memory_space<vmem>>, vector<1x384xf32>
    %55 = vector.broadcast %54 : vector<1x384xf32> to vector<8x384xf32>
    %56 = arith.addf %53, %55 : vector<8x384xf32>
    %57 = vector.extract_strided_slice %50 {offsets = [0, 0], sizes = [8, 128], strides = [1, 1]} : vector<8x384xf32> to vector<8x128xf32>
    %58 = vector.extract_strided_slice %56 {offsets = [0, 0], sizes = [8, 128], strides = [1, 1]} : vector<8x384xf32> to vector<8x128xf32>
    %59 = arith.addf %57, %58 : vector<8x128xf32>
    %60 = arith.negf %59 : vector<8x128xf32>
    %61 = math.exp %60 : vector<8x128xf32>
    %cst_38 = arith.constant 1.000000e+00 : f32
    %62 = vector.broadcast %cst_38 : f32 to vector<8x128xf32>
    %63 = arith.addf %62, %61 : vector<8x128xf32>
    %64 = arith.divf %62, %63 : vector<8x128xf32>
    %65 = vector.extract_strided_slice %50 {offsets = [0, 128], sizes = [8, 128], strides = [1, 1]} : vector<8x384xf32> to vector<8x128xf32>
    %66 = vector.extract_strided_slice %56 {offsets = [0, 128], sizes = [8, 128], strides = [1, 1]} : vector<8x384xf32> to vector<8x128xf32>
    %67 = arith.addf %65, %66 : vector<8x128xf32>
    %68 = arith.negf %67 : vector<8x128xf32>
    %69 = math.exp %68 : vector<8x128xf32>
    %cst_39 = arith.constant 1.000000e+00 : f32
    %70 = vector.broadcast %cst_39 : f32 to vector<8x128xf32>
    %71 = arith.addf %70, %69 : vector<8x128xf32>
    %72 = arith.divf %70, %71 : vector<8x128xf32>
    %73 = vector.extract_strided_slice %50 {offsets = [0, 256], sizes = [8, 128], strides = [1, 1]} : vector<8x384xf32> to vector<8x128xf32>
    %74 = vector.extract_strided_slice %56 {offsets = [0, 256], sizes = [8, 128], strides = [1, 1]} : vector<8x384xf32> to vector<8x128xf32>
    %75 = arith.mulf %64, %74 : vector<8x128xf32>
    %76 = arith.addf %73, %75 : vector<8x128xf32>
    %77 = math.tanh %76 : vector<8x128xf32>
    %cst_40 = arith.constant 1.000000e+00 : f32
    %78 = vector.broadcast %cst_40 : f32 to vector<8x128xf32>
    %79 = arith.subf %78, %72 : vector<8x128xf32>
    %80 = arith.mulf %79, %77 : vector<8x128xf32>
    %81 = arith.mulf %72, %43 : vector<8x128xf32>
    %82 = arith.addf %80, %81 : vector<8x128xf32>
    %c0_41 = arith.constant 0 : index
    %c0_42 = arith.constant 0 : index
    %83 = vector.load %arg11[%c0_41, %c0_42] : memref<8x128xf32, #tpu.memory_space<vmem>>, vector<8x128xf32>
    tpu.vector_store %arg11[%c0_41, %c0_42], %82 {strides = array<i32>} : memref<8x128xf32, #tpu.memory_space<vmem>>, vector<8x128xf32>,
    %84 = arith.truncf %82 : vector<8x128xf32> to vector<8x128xbf16>
    %c0_43 = arith.constant 0 : index
    %c0_44 = arith.constant 0 : index
    %85 = vector.load %arg8[%c0_43, %c0_44] : memref<128x256xbf16, #tpu.memory_space<vmem>>, vector<128x256xbf16>
    %cst_45 = arith.constant dense<0.000000e+00> : vector<8x256xf32>
    %86 = tpu.matmul %84, %85, %cst_45 {dimension_numbers = #tpu.dot_dimension_numbers<[1], [0], [0], [1], [0, 0, 1, 1], [], []>} : vector<8x128xbf16>, vector<128x256xbf16>, vector<8x256xf32> -> vector<8x256xf32>
    %c0_46 = arith.constant 0 : index
    %c0_47 = arith.constant 0 : index
    %87 = vector.load %arg9[%c0_46, %c0_47] : memref<1x256xf32, #tpu.memory_space<vmem>>, vector<1x256xf32>
    %88 = vector.broadcast %87 : vector<1x256xf32> to vector<8x256xf32>
    %89 = arith.addf %86, %88 : vector<8x256xf32>
    %cst_48 = arith.constant dense<0xFF800000> : vector<8xf32>
    %90 = vector.multi_reduction <maximumf>, %89, %cst_48 [1] : vector<8x256xf32> to vector<8xf32>
    %91 = vector.shape_cast %90 : vector<8xf32> to vector<8x1xf32>
    %92 = vector.broadcast %91 : vector<8x1xf32> to vector<8x256xf32>
    %93 = arith.subf %89, %92 : vector<8x256xf32>
    %94 = math.exp %93 : vector<8x256xf32>
    %cst_49 = arith.constant dense<0.000000e+00> : vector<8xf32>
    %95 = vector.multi_reduction <add>, %94, %cst_49 [1] : vector<8x256xf32> to vector<8xf32>
    %96 = vector.shape_cast %95 : vector<8xf32> to vector<8x1xf32>
    %97 = math.log %96 : vector<8x1xf32>
    %98 = arith.addf %91, %97 : vector<8x1xf32>
    %99 = vector.broadcast %98 : vector<8x1xf32> to vector<8x256xf32>
    %100 = arith.subf %89, %99 : vector<8x256xf32>
    %c0_50 = arith.constant 0 : index
    %c0_51 = arith.constant 0 : index
    %c0_52 = arith.constant 0 : index
    %101 = vector.load %arg10[%c0_50, %c0_51, %c0_52] : memref<1x8x256xf32, #tpu.memory_space<vmem>>, vector<1x8x256xf32>
    %102 = vector.shape_cast %101 : vector<1x8x256xf32> to vector<8x256xf32>
    %103 = vector.shape_cast %100 : vector<8x256xf32> to vector<1x8x256xf32>
    tpu.vector_store %arg10[%c0_50, %c0_51, %c0_52], %103 {strides = array<i32>} : memref<1x8x256xf32, #tpu.memory_space<vmem>>, vector<1x8x256xf32>,
    return
  }
  func.func @transform_0(%arg0: i32, %arg1: memref<12x8xi32, #tpu.memory_space<smem>>) -> (i32, i32) {
    %c0_i32 = arith.constant 0 : i32
    %c0_i32_0 = arith.constant 0 : i32
    %c0_i32_1 = arith.constant 0 : i32
    return %c0_i32, %c0_i32_0 : i32, i32
  }
  func.func @transform_1(%arg0: i32, %arg1: memref<12x8xi32, #tpu.memory_space<smem>>) -> (i32, i32) {
    %c0_i32 = arith.constant 0 : i32
    %c0_i32_0 = arith.constant 0 : i32
    %c0_i32_1 = arith.constant 0 : i32
    return %c0_i32, %c0_i32_0 : i32, i32
  }
  func.func @transform_2(%arg0: i32, %arg1: memref<12x8xi32, #tpu.memory_space<smem>>) -> (i32, i32, i32) {
    %c0_i32 = arith.constant 0 : i32
    %c0_i32_0 = arith.constant 0 : i32
    %c0_i32_1 = arith.constant 0 : i32
    return %arg0, %c0_i32, %c0_i32_0 : i32, i32, i32
  }
  func.func @transform_3(%arg0: i32, %arg1: memref<12x8xi32, #tpu.memory_space<smem>>) -> (i32, i32) {
    %c0_i32 = arith.constant 0 : i32
    %c0_i32_0 = arith.constant 0 : i32
    %c0_i32_1 = arith.constant 0 : i32
    return %c0_i32, %c0_i32_0 : i32, i32
  }
  func.func @transform_4(%arg0: i32, %arg1: memref<12x8xi32, #tpu.memory_space<smem>>) -> (i32, i32) {
    %c0_i32 = arith.constant 0 : i32
    %c0_i32_0 = arith.constant 0 : i32
    %c0_i32_1 = arith.constant 0 : i32
    return %c0_i32, %c0_i32_0 : i32, i32
  }
  func.func @transform_5(%arg0: i32, %arg1: memref<12x8xi32, #tpu.memory_space<smem>>) -> (i32, i32) {
    %c0_i32 = arith.constant 0 : i32
    %c0_i32_0 = arith.constant 0 : i32
    %c0_i32_1 = arith.constant 0 : i32
    return %c0_i32, %c0_i32_0 : i32, i32
  }
  func.func @transform_6(%arg0: i32, %arg1: memref<12x8xi32, #tpu.memory_space<smem>>) -> (i32, i32) {
    %c0_i32 = arith.constant 0 : i32
    %c0_i32_0 = arith.constant 0 : i32
    %c0_i32_1 = arith.constant 0 : i32
    return %c0_i32, %c0_i32_0 : i32, i32
  }
  func.func @transform_7(%arg0: i32, %arg1: memref<12x8xi32, #tpu.memory_space<smem>>) -> (i32, i32) {
    %c0_i32 = arith.constant 0 : i32
    %c0_i32_0 = arith.constant 0 : i32
    %c0_i32_1 = arith.constant 0 : i32
    return %c0_i32, %c0_i32_0 : i32, i32
  }
  func.func @transform_8(%arg0: i32, %arg1: memref<12x8xi32, #tpu.memory_space<smem>>) -> (i32, i32, i32) {
    %c0_i32 = arith.constant 0 : i32
    %c0_i32_0 = arith.constant 0 : i32
    %c0_i32_1 = arith.constant 0 : i32
    return %arg0, %c0_i32, %c0_i32_0 : i32, i32, i32
  }
  func.func @transform_9(%arg0: i32, %arg1: memref<12x8xi32, #tpu.memory_space<smem>>) -> (i32, i32) {
    %c0_i32 = arith.constant 0 : i32
    %c0_i32_0 = arith.constant 0 : i32
    %c0_i32_1 = arith.constant 0 : i32
    return %c0_i32, %c0_i32_0 : i32, i32
  }
}

</mosaic_0001>

<bundles_post_ra>
// kernel: lm_forward_seq.1
= control target key start
LH: loop header
LB: loop body
LE: loop exit
PB: predicated region body
PF: predicated region fallthrough
CT: control target
= control target key end

     0   :  { %s1405_s16 = smov [#allocation4]   ;;  %s1928_s0 = inlined_call_operand.vmem [shape: s32[12,8], index: 0, kind: input, shape index: {}]   ;;  %s1929_s1 = inlined_call_operand.vmem [shape: f32[256,384], index: 1, kind: input, shape index: {}]   ;;  %s1930_s2 = inlined_call_operand.vmem [shape: f32[8,384], index: 2, kind: input, shape index: {}]   ;;  %s1931_s3 = inlined_call_operand.vmem [shape: f32[12,1,384], index: 3, kind: input, shape index: {}]   ;;  %s1932_s4 = inlined_call_operand.vmem [shape: f32[8,128], index: 4, kind: input, shape index: {}]   ;;  %s1933_s5 = inlined_call_operand.vmem [shape: bf16[128,384], index: 5, kind: input, shape index: {}]   ;;  %s1934_s6 = inlined_call_operand.vmem [shape: f32[1,384], index: 6, kind: input, shape index: {}]   ;;  %s1935_s7 = inlined_call_operand.vmem [shape: bf16[128,256], index: 7, kind: input, shape index: {}]   ;;  %s1936_s8 = inlined_call_operand.vmem [shape: f32[1,256], index: 8, kind: input, shape index: {}]   ;;  %s1937_s9 = inlined_call_operand.hbm [shape: f32[12,8,256], index: 9, kind: output, shape index: {0}]   ;;  %s1938_s10 = inlined_call_operand.hbm [shape: f32[8,128], index: 10, kind: output, shape index: {1}]  }
   0x1   :  { %1949 = sst [smem:[#allocation19_spill]] %s1931_s3  ;;  %s17_s15 = sshll.u32 %s1928_s0, 4  ;;  %s18_s15 = int_to_ptr.vmem [resolvable:$true] %s17_s15 }
   0x2   :  { %1950 = sst [smem:[#allocation20_spill]] %s1932_s4 }
   0x3   :  { %1951 = sst [smem:[#allocation21_spill]] %s1937_s9 }
   0x4   :  { %20 = dma.vmem_to_smem %s18_s15, 256, %s1405_s16, [#allocation3] }
   0x5   :  { %1379 = dma.done.wait [#allocation3], 256 }
   0x6   :  { %1380 = vsyncadd [#allocation3], 4294967040 }
   0x7   :  { %23 = sfence }
   0x8   :  { %24 = vsyncpa [#allocation6], 0 }
   0x9   :  { %26 = vsyncpa [#allocation6 + $0x1], 0 }
   0xa   :  { %27 = vsyncpa [#allocation8], 0  ;;  %s1465_s17 = smov 0   ;;  %s1467_s18 = smov 0  }
   0xb   :  { %s1469_s19 = smov 0   ;;  %s1471_s20 = smov 0  }
   0xc LB: > { %1952 = sst [smem:[#allocation12_spill]] %s1391_s17  ;;  %s1486_s0 = sadd.s32 4294967295, %s1403_s20   ;;  %s1403_s20 = sphi %s1471_s20, %s1972_s20   ;;  %s1399_s19 = sphi %s1469_s19, %s1974_s19   ;;  %s1395_s18 = sphi %s1467_s18, %s1976_s18   ;;  %s1391_s17 = sphi %s1465_s17, %s1975_s17  }
   0xd   : > { %1953 = sst [smem:[#allocation13_spill]] %s1399_s19  ;;  %s1006_s21 = sadd.s32 4294967294, %s1403_s20  }
   0xe   : > { %1954 = sst [smem:[#allocation14_spill]] %s1403_s20  ;;  %s1490_s22 = sadd.s32 1, %s1403_s20  }
   0xf   : > { %1955 = sst [smem:[#allocation15_spill]] %s1490_s22  ;;  %s213_s23 = sadd.s32 1, %s1399_s19 }
  0x10   : > { %s210_s24 = ssub.s32 %s1403_s20, %s1490_s22  ;;  %p223_p0 = scmp.ne.s32.totalorder %s1399_s19, %s1395_s18 }
  0x11   : > { %p211_p1 = scmp.eq.s32.totalorder %s210_s24, 0  ;;  %p224_p2 = scmp.eq.s32.totalorder %s1486_s0, 11 }
  0x12   : > { %p229_p3 = scmp.ne.s32.totalorder %s1395_s18, %s1391_s17  ;;  %p230_p4 = scmp.eq.s32.totalorder %s1006_s21, 11 }
  0x13   : > { %s1501_s25 = scalar_select %p211_p1, %s1399_s19, %s213_s23  }
  0x14   : > { %p1505_p5 = por %p224_p2, %p223_p0  ;;  %p1509_p6 = por %p230_p4, %p229_p3 }
  0x15   : > { %1956 = sst [smem:[#allocation16_spill]] %s1501_s25  ;;  %p1009_p7 = scmp.ge.s32.totalorder %s1403_s20, 1 }
  0x16   : > { %s1957_s26 = scalar_select %p1505_p5, 1, 0 }
  0x17   : > { %s1959_s27 = scalar_select %p1509_p6, 1, 0 }
  0x18   : > { %1958 = sst [smem:[#allocation17_spill]] %s1957_s26  ;;  %p297_p8 = scmp.lt.s32.totalorder %s1403_s20, 13 }
  0x19   : > { %1960 = sst [smem:[#allocation18_spill]] %s1959_s27 }
  0x1a   : > { %p298_p9 = pnand %p1009_p7, %p297_p8 }
  0x1b   : > { %s1939_s28 = sand.u32 (!%p298_p9), 1, %s1395_s18   ;;  %p332_p10 = scmp.lt.s32.totalorder (!%p298_p9), %s1486_s0, 11 }
  0x1c   : > { %301 = sbr.rel (%p298_p9) target bundleno = 652 (0x28c), region = 52  ;;  %s1010_s29 = sshll.u32 (!%p298_p9), %s1939_s28, 4 }
  0x1d   : > { %s1961_s3 = sld [smem:[#allocation19_spill]] (!%p298_p9)  ;;  %s1525_s15 = scalar_lea.vmem (!%p298_p9), [#allocation5], %s1010_s29 }
  0x1e   : > { %p1011_p11 = scmp.ne.s32.totalorder (!%p298_p9), %s1486_s0, 0 }
  0x21   : > { %s333_s30 = scalar_select %p332_p10, %s1486_s0, 11 }
  0x22   : > { %339 = sbr.rel (%p1011_p11) target bundleno = 42 (0x2a), region = 56  ;;  %s1962_s4 = sld [smem:[#allocation20_spill]] (!%p1011_p11) }
  0x23   : > { %s1231_s11 = smul.u32 3, %s333_s30 }
  0x25   : > { %s1523_s14 = scalar_lea.vmem %s1961_s3, %s1231_s11 }
  0x28   : > { %v340_v0 = vld [vmem:[%s1962_s4] sm:$0xff] }
  0x29   : > { %341 = vst [vmem:[#allocation7] sm:$0xff] %v340_v0 }
  0x2a PF: > { %v1107_v1 = vld [vmem:[%s1933_s5 + $0xa8] sm:$0xf]  ;;  %v1212_v2 = vld [vmem:[%s1933_s5 + $0xb0] sm:$0xf0]  ;;  %v1211_v3 = vld [vmem:[%s1933_s5 + $0xac] sm:$0xf]  ;;  %v353_v55 = vlaneseq }
  0x2b   : > { %v1108_v4 = vor.u32 %v1212_v2, %v1107_v1  ;;  %v1109_v5 = vld [vmem:[%s1933_s5 + $0xb4] sm:$0xf0]  ;;  %v1095_v6 = vld [vmem:[%s1933_s5 + $0x90] sm:$0xf]  ;;  %v1209_v7 = vld [vmem:[%s1933_s5 + $0x98] sm:$0xf0] }
  0x2c   : > { %v1112_v8 = vor.u32 %v1211_v3, %v1109_v5  ;;  %v1208_v9 = vld [vmem:[%s1933_s5 + $0x94] sm:$0xf]  ;;  %v1097_v10 = vld [vmem:[%s1933_s5 + $0x9c] sm:$0xf0]  ;;  %v1096_v11 = vor.u32 %v1209_v7, %v1095_v6  ;;  %v1083_v13 = vld [vmem:[%s1933_s5 + $0x78] sm:$0xf] }
  0x2d   : > { %647 = vmatpush.bf16.msra.mxu0 %v1108_v4  ;;  %v1100_v12 = vor.u32 %v1208_v9, %v1097_v10  ;;  %v1206_v14 = vld [vmem:[%s1933_s5 + $0x80] sm:$0xf0]  ;;  %v1205_v15 = vld [vmem:[%s1933_s5 + $0x7c] sm:$0xf]  ;;  %v1085_v16 = vld [vmem:[%s1933_s5 + $0x84] sm:$0xf0] }
  0x2e   : > { %660 = vmatpush.bf16.msra.mxu1 %v1112_v8  ;;  %v1115_v17 = vld [vmem:[%s1933_s5 + $0xb0] sm:$0xf]  ;;  %v1084_v18 = vor.u32 %v1206_v14, %v1083_v13  ;;  %v1213_v19 = vld [vmem:[%s1933_s5 + $0xb8] sm:$0xf0]  ;;  %v1088_v20 = vor.u32 %v1205_v15, %v1085_v16  ;;  %v1071_v21 = vld [vmem:[%s1933_s5 + $0x60] sm:$0xf] }
  0x2f   : > { %v1203_v22 = vld [vmem:[%s1933_s5 + $0x68] sm:$0xf0]  ;;  %v1116_v23 = vor.u32 %v1213_v19, %v1115_v17  ;;  %v1103_v24 = vld [vmem:[%s1933_s5 + $0x98] sm:$0xf]  ;;  %v1202_v25 = vld [vmem:[%s1933_s5 + $0x64] sm:$0xf] }
  0x30   : > { %v1073_v26 = vld [vmem:[%s1933_s5 + $0x6c] sm:$0xf0]  ;;  %v1210_v27 = vld [vmem:[%s1933_s5 + $0xa0] sm:$0xf0]  ;;  %v1072_v29 = vor.u32 %v1203_v22, %v1071_v21  ;;  %v1091_v30 = vld [vmem:[%s1933_s5 + $0x80] sm:$0xf] }
  0x31   : > { %648 = vmatpush.bf16.msra.mxu0 %v1096_v11  ;;  %673 = vmatpush.bf16.msra.mxu2 %v1116_v23  ;;  %v1104_v28 = vor.u32 %v1210_v27, %v1103_v24  ;;  %v1207_v31 = vld [vmem:[%s1933_s5 + $0x88] sm:$0xf0]  ;;  %v1076_v32 = vor.u32 %v1202_v25, %v1073_v26  ;;  %v1059_v33 = vld [vmem:[%s1933_s5 + $0x48] sm:$0xf]  ;;  %v1200_v34 = vld [vmem:[%s1933_s5 + $0x50] sm:$0xf0] }
  0x32   : > { %661 = vmatpush.bf16.msra.mxu1 %v1100_v12  ;;  %v1199_v35 = vld [vmem:[%s1933_s5 + $0x4c] sm:$0xf]  ;;  %v1061_v36 = vld [vmem:[%s1933_s5 + $0x54] sm:$0xf0]  ;;  %s1610_s3 = sshll.u32 %s1486_s0, 7  ;;  %v1092_v37 = vor.u32 %v1207_v31, %v1091_v30  ;;  %v1060_v38 = vor.u32 %v1200_v34, %v1059_v33  ;;  %vm1689_vm0 = vcmp.lt.s32.totalorder %v353_v55, 384 }
  0x33   : > { %v1079_v39 = vld [vmem:[%s1933_s5 + $0x68] sm:$0xf]  ;;  %v1204_v40 = vld [vmem:[%s1933_s5 + $0x70] sm:$0xf0]  ;;  %v1064_v41 = vor.u32 %v1199_v35, %v1061_v36  ;;  %v1047_v42 = vld [vmem:[%s1933_s5 + $0x30] sm:$0xf] }
  0x34   : > { %v1197_v43 = vld [vmem:[%s1933_s5 + $0x38] sm:$0xf0]  ;;  %s1625_s12 = sld [smem:[#allocation4 + %s1610_s3]]  ;;  %s359_s13 = sadd.s32 1, %s1610_s3  ;;  %v1196_v44 = vld [vmem:[%s1933_s5 + $0x34] sm:$0xf]  ;;  %v1080_v46 = vor.u32 %v1204_v40, %v1079_v39 }
  0x35   : > { %649 = vmatpush.bf16.msra.mxu0 %v1084_v18  ;;  %674 = vmatpush.bf16.msra.mxu2 %v1104_v28  ;;  %v1049_v45 = vld [vmem:[%s1933_s5 + $0x3c] sm:$0xf0]  ;;  %s1634_s4 = sld [smem:[#allocation4 + %s359_s13]]  ;;  %s373_s24 = sadd.s32 2, %s1610_s3  ;;  %v1048_v47 = vor.u32 %v1197_v43, %v1047_v42  ;;  %v1067_v48 = vld [vmem:[%s1933_s5 + $0x50] sm:$0xf] }
  0x36   : > { %662 = vmatpush.bf16.msra.mxu1 %v1088_v20  ;;  %s1637_s30 = sld [smem:[#allocation4 + %s373_s24]]  ;;  %s387_s11 = sadd.s32 3, %s1610_s3  ;;  %v1201_v49 = vld [vmem:[%s1933_s5 + $0x58] sm:$0xf0]  ;;  %v1052_v50 = vor.u32 %v1196_v44, %v1049_v45  ;;  %v1035_v51 = vld [vmem:[%s1933_s5 + $0x18] sm:$0xf] }
  0x37   : > { %s1646_s13 = sld [smem:[#allocation4 + %s387_s11]]  ;;  %s401_s23 = sadd.s32 4, %s1610_s3  ;;  %v1194_v52 = vld [vmem:[%s1933_s5 + $0x20] sm:$0xf0]  ;;  %v1193_v53 = vld [vmem:[%s1933_s5 + $0x1c] sm:$0xf]  ;;  %v1068_v56 = vor.u32 %v1201_v49, %v1067_v48 }
  0x38   : > { %s1655_s25 = sld [smem:[#allocation4 + %s401_s23]]  ;;  %s415_s29 = sadd.s32 5, %s1610_s3  ;;  %v1037_v54 = vld [vmem:[%s1933_s5 + $0x24] sm:$0xf0]  ;;  %v1036_v57 = vor.u32 %v1194_v52, %v1035_v51  ;;  %v1055_v58 = vld [vmem:[%s1933_s5 + $0x38] sm:$0xf] }
  0x39   : > { %650 = vmatpush.bf16.msra.mxu0 %v1072_v29  ;;  %675 = vmatpush.bf16.msra.mxu2 %v1092_v37  ;;  %s1664_s17 = sld [smem:[#allocation4 + %s415_s29]]  ;;  %v1198_v59 = vld [vmem:[%s1933_s5 + $0x40] sm:$0xf0]  ;;  %v1040_v60 = vor.u32 %v1193_v53, %v1037_v54  ;;  %v1023_v61 = vld [vmem:[%s1933_s5] sm:$0xf]  ;;  %v1694_v2 = vld [vmem:[#allocation7] sm:$0xff] }
  0x3a   : > { %663 = vmatpush.bf16.msra.mxu1 %v1076_v32  ;;  %s344_s19 = sshra.s32 %s1625_s12, 3  ;;  %s347_s22 = sand.u32 7, %s1625_s12  ;;  %v1191_v62 = vld [vmem:[%s1933_s5 + $0x8] sm:$0xf0]  ;;  %v1190_v63 = vld [vmem:[%s1933_s5 + $0x4] sm:$0xf]  ;;  %v1056_v3 = vor.u32 %v1198_v59, %v1055_v58  ;;  %v478_v10 = vpack.c.bf16 %v1694_v2, %v1694_v2 }
  0x3b   : > { %s1013_s27 = smul.u32 24, %s344_s19  ;;  %s361_s29 = sshra.s32 %s1634_s4, 3  ;;  %v1025_v0 = vld [vmem:[%s1933_s5 + $0xc] sm:$0xf0]  ;;  %v1043_v4 = vld [vmem:[%s1933_s5 + $0x20] sm:$0xf]  ;;  %v1024_v5 = vor.u32 %v1191_v62, %v1023_v61 }
  0x3c   : > { %s364_s26 = sand.u32 7, %s1634_s4  ;;  %s1014_s9 = smul.u32 24, %s361_s29  ;;  %v1195_v6 = vld [vmem:[%s1933_s5 + $0x28] sm:$0xf0]  ;;  %v1028_v8 = vor.u32 %v1190_v63, %v1025_v0  ;;  %v1031_v12 = vld [vmem:[%s1933_s5 + $0x8] sm:$0xf] }
  0x3d   : > { %651 = vmatpush.bf16.msra.mxu0 %v1060_v38  ;;  %676 = vmatpush.bf16.msra.mxu2 %v1080_v46  ;;  %s350_s19 = sadd.s32 %s1013_s27, %s347_s22  ;;  %s375_s28 = sshra.s32 %s1637_s30, 3  ;;  %v1044_v11 = vor.u32 %v1195_v6, %v1043_v4  ;;  %v1192_v13 = vld [vmem:[%s1933_s5 + $0x10] sm:$0xf0]  ;;  %v1177_v21 = vld [vmem:[%s1935_s7 + $0x70] sm:$0xf]  ;;  %v472_v46 = vld [vmem:[%s1930_s2] sm:$0xff] }
  0x3e   : > { %664 = vmatpush.bf16.msra.mxu1 %v1064_v41  ;;  %s351_s12 = scalar_lea.vmem %s1929_s1, %s350_s19  ;;  %s367_s23 = sadd.s32 %s1014_s9, %s364_s26  ;;  %v1032_v15 = vor.u32 %v1192_v13, %v1031_v12  ;;  %v1229_v22 = vld [vmem:[%s1935_s7 + $0x74] sm:$0xf0]  ;;  %v1228_v23 = vld [vmem:[%s1935_s7 + $0x74] sm:$0xf]  ;;  %v1179_v25 = vld [vmem:[%s1935_s7 + $0x78] sm:$0xf0] }
  0x3f   : > { %v352_v7 = vld [vmem:[%s351_s12] ss:$8 sm:$0x7]  ;;  %s368_s21 = scalar_lea.vmem %s1929_s1, %s367_s23  ;;  %s378_s4 = sand.u32 7, %s1637_s30  ;;  %v1178_v24 = vor.u32 %v1229_v22, %v1177_v21  ;;  %v1182_v26 = vor.u32 %v1228_v23, %v1179_v25  ;;  %v1226_v30 = vld [vmem:[%s1935_s7 + $0x64] sm:$0xf] }
  0x40   : > { %357 = vst.msk [vmem:[#allocation2] ss:$8 sm:$0x7] %vm1689_vm0, %v352_v7  ;;  %v369_v9 = vld [vmem:[%s368_s21] ss:$8 sm:$0x7] }
  0x41   : > { %652 = vmatpush.bf16.msra.mxu0 %v1048_v47  ;;  %677 = vmatpush.bf16.msra.mxu2 %v1068_v56  ;;  %371 = vst.msk [vmem:[#allocation2 + $0x1] ss:$8 sm:$0x7] %vm1689_vm0, %v369_v9  ;;  %s1015_s9 = smul.u32 24, %s375_s28  ;;  %s389_s26 = sshra.s32 %s1646_s13, 3  ;;  %v473_v49 = vld [vmem:[%s1930_s2 + $0x8] sm:$0xff] }
  0x42   : > { %665 = vmatpush.bf16.msra.mxu1 %v1052_v50  ;;  %s392_s19 = sand.u32 7, %s1646_s13  ;;  %s1016_s30 = smul.u32 24, %s389_s26  ;;  %v1773_v27 = vld [vmem:[%s1523_s14] sm:$0x7]  ;;  %837 = vmatpush.bf16.msra.mxu3 %v1178_v24  ;;  %v1227_v29 = vld [vmem:[%s1935_s7 + $0x64] sm:$0xf0] }
  0x43   : > { %s381_s23 = sadd.s32 %s1015_s9, %s378_s4  ;;  %s403_s28 = sshra.s32 %s1655_s25, 3  ;;  %v1169_v28 = vld [vmem:[%s1935_s7 + $0x60] sm:$0xf]  ;;  %v1171_v32 = vld [vmem:[%s1935_s7 + $0x68] sm:$0xf0]  ;;  %v463_v33 = vperm.slane %v1773_v27, 0 }
  0x44   : > { %s382_s24 = scalar_lea.vmem %s1929_s1, %s381_s23  ;;  %s395_s13 = sadd.s32 %s1016_s30, %s392_s19  ;;  %v1170_v31 = vor.u32 %v1227_v29, %v1169_v28  ;;  %v1174_v34 = vor.u32 %v1226_v30, %v1171_v32  ;;  %v1791_v36 = vld [vmem:[%s1934_s6] sm:$0x7]  ;;  %v464_v38 = vperm.slane %v1773_v27, 1  ;;  %v1161_v39 = vld [vmem:[%s1935_s7 + $0x50] sm:$0xf] }
  0x45   : > { %653 = vmatpush.bf16.msra.mxu0 %v1036_v57  ;;  %678 = vmatpush.bf16.msra.mxu2 %v1056_v3  ;;  %v383_v14 = vld [vmem:[%s382_s24] ss:$8 sm:$0x7]  ;;  %s396_s26 = scalar_lea.vmem %s1929_s1, %s395_s13  ;;  %s406_s20 = sand.u32 7, %s1655_s25  ;;  %v1225_v40 = vld [vmem:[%s1935_s7 + $0x54] sm:$0xf0] }
  0x46   : > { %666 = vmatpush.bf16.msra.mxu1 %v1040_v60  ;;  %385 = vst.msk [vmem:[#allocation2 + $0x2] ss:$8 sm:$0x7] %vm1689_vm0, %v383_v14  ;;  %v397_v16 = vld [vmem:[%s396_s26] ss:$8 sm:$0x7]  ;;  %838 = vmatpush.bf16.msra.mxu3 %v1170_v31  ;;  %v1162_v42 = vor.u32 %v1225_v40, %v1161_v39 }
  0x47   : > { %399 = vst.msk [vmem:[#allocation2 + $0x3] ss:$8 sm:$0x7] %vm1689_vm0, %v397_v16  ;;  %s1017_s4 = smul.u32 24, %s403_s28  ;;  %s417_s9 = sshra.s32 %s1664_s17, 3  ;;  %v513_v47 = vperm.slane %v1791_v36, 0 }
  0x48   : > { %s420_s19 = sand.u32 7, %s1664_s17  ;;  %s1018_s30 = smul.u32 24, %s417_s9  ;;  %v1224_v41 = vld [vmem:[%s1935_s7 + $0x54] sm:$0xf]  ;;  %v1163_v43 = vld [vmem:[%s1935_s7 + $0x58] sm:$0xf0] }
  0x49   : > { %654 = vmatpush.bf16.msra.mxu0 %v1024_v5  ;;  %679 = vmatpush.bf16.msra.mxu2 %v1044_v11  ;;  %s409_s29 = sadd.s32 %s1017_s4, %s406_s20  ;;  %s1965_s11 = sadd.s32 6, %s1610_s3  ;;  %v1166_v45 = vor.u32 %v1224_v41, %v1163_v43  ;;  %v1153_v50 = vld [vmem:[%s1935_s7 + $0x40] sm:$0xf]  ;;  %v1223_v51 = vld [vmem:[%s1935_s7 + $0x44] sm:$0xf0]  ;;  %v514_v53 = vperm.slane %v1791_v36, 1 }
  0x4a   : > { %667 = vmatpush.bf16.msra.mxu1 %v1028_v8  ;;  %s430_s12 = sld [smem:[#allocation4 + %s1965_s11]]  ;;  %s410_s22 = scalar_lea.vmem %s1929_s1, %s409_s29  ;;  %839 = vmatpush.bf16.msra.mxu3 %v1162_v42  ;;  %v1222_v52 = vld [vmem:[%s1935_s7 + $0x44] sm:$0xf]  ;;  %v1154_v54 = vor.u32 %v1223_v51, %v1153_v50  ;;  %v1155_v55 = vld [vmem:[%s1935_s7 + $0x48] sm:$0xf0]  ;;  %v465_v40 = vperm.slane %v1773_v27, 2 }
  0x4b   : > { %s423_s27 = sadd.s32 %s1018_s30, %s420_s19  ;;  %v411_v17 = vld [vmem:[%s410_s22] ss:$8 sm:$0x7]  ;;  %s443_s21 = sadd.s32 7, %s1610_s3  ;;  %v1158_v57 = vor.u32 %v1222_v52, %v1155_v55  ;;  %v1221_v63 = vld [vmem:[%s1935_s7 + $0x34] sm:$0xf0] }
  0x4c   : > { %655 = vmatmul.bf16.vlgmr.msra.gmra.mxu0 %v478_v10  ;;  %s424_s16 = scalar_lea.vmem %s1929_s1, %s423_s27  ;;  %413 = vst.msk [vmem:[#allocation2 + $0x4] ss:$8 sm:$0x7] %vm1689_vm0, %v411_v17  ;;  %s444_s17 = sld [smem:[#allocation4 + %s443_s21]]  ;;  %v1145_v62 = vld [vmem:[%s1935_s7 + $0x30] sm:$0xf] }
  0x4d   : > { %668 = vmatmul.bf16.vlgmr.msra.gmra.mxu1 %v478_v10  ;;  %680 = vmatpush.bf16.msra.mxu2 %v1032_v15  ;;  %v425_v18 = vld [vmem:[%s424_s16] ss:$8 sm:$0x7]  ;;  %v1220_v0 = vld [vmem:[%s1935_s7 + $0x34] sm:$0xf]  ;;  %v1146_v3 = vor.u32 %v1221_v63, %v1145_v62  ;;  %s1406_s19 = smov [#allocation7]  }
  0x4e   : > { %427 = vst.msk [vmem:[#allocation2 + $0x5] ss:$8 sm:$0x7] %vm1689_vm0, %v425_v18  ;;  %850 = vmatpush.bf16.msrb.mxu0 %v1182_v26  ;;  %840 = vmatpush.bf16.msra.mxu3 %v1154_v54  ;;  %v1147_v4 = vld [vmem:[%s1935_s7 + $0x38] sm:$0xf0]  ;;  %v474_v51 = vld [vmem:[%s1930_s2 + $0x10] sm:$0xff] }
  0x4f   : > { %v1150_v6 = vor.u32 %v1220_v0, %v1147_v4  ;;  %v1137_v9 = vld [vmem:[%s1935_s7 + $0x20] sm:$0xf]  ;;  %v1218_v13 = vld [vmem:[%s1935_s7 + $0x24] sm:$0xf]  ;;  %v1139_v14 = vld [vmem:[%s1935_s7 + $0x28] sm:$0xf0] }
  0x50   : > { %681 = vmatmul.bf16.vlgmr.msra.gmra.mxu2 %v478_v10  ;;  %s431_s28 = sshra.s32 %s430_s12, 3  ;;  %s434_s26 = sand.u32 7, %s430_s12  ;;  %v1219_v10 = vld [vmem:[%s1935_s7 + $0x24] sm:$0xf0]  ;;  %v1142_v15 = vor.u32 %v1218_v13, %v1139_v14  ;;  %v1129_v16 = vld [vmem:[%s1935_s7 + $0x10] sm:$0xf] }
  0x51   : > { %s1019_s20 = smul.u32 24, %s431_s28  ;;  %v1138_v12 = vor.u32 %v1219_v10, %v1137_v9  ;;  %v1217_v17 = vld [vmem:[%s1935_s7 + $0x14] sm:$0xf0]  ;;  %v1216_v18 = vld [vmem:[%s1935_s7 + $0x14] sm:$0xf]  ;;  %s1230_s14 = sshll.u32 %s1486_s0, 4 }
  0x52   : > { %s445_s29 = sshra.s32 %s444_s17, 3  ;;  %s448_s3 = sand.u32 7, %s444_s17  ;;  %851 = vmatpush.bf16.msrb.mxu0 %v1174_v34  ;;  %841 = vmatpush.bf16.msra.mxu3 %v1146_v3  ;;  %v1131_v21 = vld [vmem:[%s1935_s7 + $0x18] sm:$0xf0]  ;;  %v1121_v24 = vld [vmem:[%s1935_s7] sm:$0xf] }
  0x53   : > { %s437_s4 = sadd.s32 %s1019_s20, %s434_s26  ;;  %s1020_s11 = smul.u32 24, %s445_s29  ;;  %v1134_v23 = vor.u32 %v1216_v18, %v1131_v21  ;;  %v1215_v25 = vld [vmem:[%s1935_s7 + $0x4] sm:$0xf0]  ;;  %v1214_v26 = vld [vmem:[%s1935_s7 + $0x4] sm:$0xf] }
  0x54   : > { %s438_s30 = scalar_lea.vmem %s1929_s1, %s437_s4  ;;  %v1123_v28 = vld [vmem:[%s1935_s7 + $0x8] sm:$0xf0]  ;;  %v1122_v29 = vor.u32 %v1215_v25, %v1121_v24  ;;  %s1966_s22 = sld [smem:[#allocation21_spill]] }
  0x55   : > { %v439_v19 = vld [vmem:[%s438_s30] ss:$8 sm:$0x7]  ;;  %s451_s25 = sadd.s32 %s1020_s11, %s448_s3  ;;  %v1126_v32 = vor.u32 %v1214_v26, %v1123_v28  ;;  %s908_s30 = sshll.u32 %s1406_s19, 4  ;;  %s909_s30 = int_to_ptr.vmem [resolvable:$true] %s908_s30 }
  0x56   : > { %441 = vst.msk [vmem:[#allocation2 + $0x6] ss:$8 sm:$0x7] %vm1689_vm0, %v439_v19  ;;  %s452_s27 = scalar_lea.vmem %s1929_s1, %s451_s25  ;;  %852 = vmatpush.bf16.msrb.mxu0 %v1166_v45  ;;  %842 = vmatpush.bf16.msra.mxu3 %v1138_v12  ;;  %s910_s11 = sshll.u32 %s1938_s10, 4  ;;  %s911_s11 = int_to_ptr.hbm [resolvable:$true] %s910_s11 }
  0x57   : > { %v453_v20 = vld [vmem:[%s452_s27] ss:$8 sm:$0x7]  ;;  %s896_s24 = sshll.u32 %s1525_s15, 4  ;;  %s1968_s16 = sand.u32 1, %s1395_s18   ;;  %s897_s24 = int_to_ptr.vmem [resolvable:$true] %s896_s24 }
  0x58   : > { %455 = vst.msk [vmem:[#allocation2 + $0x7] ss:$8 sm:$0x7] %vm1689_vm0, %v453_v20  ;;  %v1130_v20 = vor.u32 %v1217_v17, %v1129_v16  ;;  %s883_s21 = scalar_lea.sflag [#allocation6], %s1968_s16 }
  0x5a   : > { %853 = vmatpush.bf16.msrb.mxu0 %v1158_v57  ;;  %843 = vmatpush.bf16.msra.mxu3 %v1130_v20  ;;  %s894_s27 = scalar_lea.hbm %s1966_s22, %s1230_s14  ;;  %s1355_s4 = scalar_lea.hbm %s1966_s22, 192 }
  0x5b   : > { %s898_s13 = sshll.u32 %s894_s27, 4  ;;  %s899_s13 = int_to_ptr.hbm [resolvable:$true] %s898_s13 }
  0x5c   : > { %s1349_s17 = sshra.s32 %s899_s13, 4  ;;  %s1350_s17 = int_to_ptr.hbm [resolvable:$true] %s1349_s17 }
  0x5d   : > { %s1351_s28 = scalar_lea.hbm %s1350_s17, 16  ;;  %p1356_p1 = scmp.lt.s32.totalorder %s1350_s17, %s1966_s22 }
  0x5e   : > { %854 = vmatpush.bf16.msrb.mxu0 %v1150_v6  ;;  %844 = vmatpush.bf16.msra.mxu3 %v1122_v29  ;;  %p1352_p12 = scmp.ne.s32.totalorder %s1350_s17, %s1351_s28  ;;  %p1357_p3 = scmp.lt.s32.totalorder %s1355_s4, %s1351_s28 }
  0x5f   : > { %v458_v35 = vld [vmem:[#allocation2] sm:$0xff]  ;;  %v459_v37 = vld [vmem:[#allocation2 + $0x8] sm:$0xff]  ;;  %v460_v42 = vld [vmem:[#allocation2 + $0x10] sm:$0xff] }
  0x60   : > { %v469_v44 = vadd.f32 %v463_v33, %v458_v35  ;;  %v470_v48 = vadd.f32 %v464_v38, %v459_v37  ;;  %p1353_p13 = pnand %p1352_p12, %p1505_p5  ;;  %p1358_p4 = por %p1357_p3, %p1356_p1 }
  0x62   : > { %v475_v56 = vadd.f32 %v472_v46, %v469_v44  ;;  %v476_v59 = vadd.f32 %v473_v49, %v470_v48  ;;  %855 = vmatpush.bf16.msrb.mxu0 %v1142_v15  ;;  %v515_v44 = vperm.slane %v1791_v36, 2  ;;  %v471_v48 = vadd.f32 %v465_v40, %v460_v42  ;;  %p1354_p0 = pneg %p1353_p13 }
  0x64   : > { %v477_v55 = vadd.f32 %v474_v51, %v471_v48  ;;  %p1359_p7 = pnand %p1358_p4, %p1354_p0 }
  0x66   : > { %856 = vmatpush.bf16.msrb.mxu0 %v1134_v23 }
  0x6a   : > { %857 = vmatpush.bf16.msrb.mxu0 %v1126_v32 }
  0xc9   : > { %v656_v58 = vpop.f32.mrf.mxu0 }
  0xca   : > { %v657_v60 = vadd.f32 %v656_v58, %v513_v47  ;;  %v669_v61 = vpop.f32.mrf.mxu1 }
  0xcb   : > { %v670_v1 = vadd.f32 %v669_v61, %v514_v53 }
  0xcc   : > { %v686_v5 = vadd.f32 %v657_v60, %v475_v56 }
  0xcd   : > { %v706_v7 = vadd.f32 %v670_v1, %v476_v59 }
  0xce   : > { %v1117_v8 = vmul.f32 -1.442695, %v686_v5 }
  0xcf   : > { %v1118_v11 = vmul.f32 -1.442695, %v706_v7 }
  0xd0   : > { %1279 = vpow2.f32 %v1117_v8  ;;  %v751_v8 = vld [vmem:[%s1936_s8] sm:$0x3] }
  0xd1   : > { %1281 = vpow2.f32 %v1118_v11  ;;  %v658_v19 = vpop.f32.mrf.mxu0  ;;  %v754_v10 = vperm.slane %v751_v8, 1  ;;  %v753_v11 = vperm.slane %v751_v8, 0 }
  0xd2   : > { %v671_v22 = vpop.f32.mrf.mxu1 }
  0xd3   : > { %v682_v31 = vpop.f32.mrf.mxu2 }
  0xd4   : > { %v683_v53 = vadd.f32 %v682_v31, %v515_v44 }
  0xd6   : > { %v1280_v30 = vpop.eup %1279 }
  0xd7   : > { %v1282_v33 = vpop.eup %1281  ;;  %v690_v34 = vadd.f32 1.0, %v1280_v30 }
  0xd8   : > { %v710_v35 = vadd.f32 1.0, %v1282_v33 }
  0xd9   : > { %1283 = vrcp.f32 %v690_v34  ;;  %v702_v46 = vand.u32 2147483648, %v690_v34  ;;  %v700_v50 = vand.u32 2147483647, %v690_v34  ;;  %vm696_vm2 = vweird.f32 %v690_v34 }
  0xda   : > { %1285 = vrcp.f32 %v710_v35  ;;  %vm716_vm5 = vweird.f32 %v710_v35  ;;  %v722_v59 = vand.u32 2147483648, %v710_v35  ;;  %v720_v60 = vand.u32 2147483647, %v710_v35 }
  0xdb   : > { %v684_v37 = vpop.f32.mrf.mxu2  ;;  %v703_v27 = vor.u32 1.1754944e-38, %v702_v46  ;;  %vm701_vm4 = vcmp.eq.f32.partialorder %v700_v50, 8.507059e+37 }
  0xdc   : > { %v723_v63 = vor.u32 1.1754944e-38, %v722_v59  ;;  %vm721_vm8 = vcmp.eq.f32.partialorder %v720_v60, 8.507059e+37 }
  0xdf   : > { %v1284_v38 = vpop.eup %1283 }
  0xe0   : > { %v1286_v39 = vpop.eup %1285  ;;  %v692_v41 = vmul.f32 %v1284_v38, %v690_v34  ;;  %vm697_vm1 = vweird.f32 %v1284_v38 }
  0xe1   : > { %v712_v43 = vmul.f32 %v1286_v39, %v710_v35  ;;  %vm698_vm3 = vmor %vm696_vm2, %vm697_vm1  ;;  %vm717_vm6 = vweird.f32 %v1286_v39 }
  0xe2   : > { %v693_v45 = vsub.f32 1.0, %v692_v41  ;;  %vm718_vm7 = vmor %vm716_vm5, %vm717_vm6 }
  0xe3   : > { %v713_v47 = vsub.f32 1.0, %v712_v43 }
  0xe4   : > { %v694_v49 = vmul.f32 %v1284_v38, %v693_v45 }
  0xe5   : > { %v714_v52 = vmul.f32 %v1286_v39, %v713_v47 }
  0xe6   : > { %v695_v54 = vadd.f32 %v1284_v38, %v694_v49 }
  0xe7   : > { %v715_v57 = vadd.f32 %v1286_v39, %v714_v52 }
  0xe8   : > { %v699_v56 = vsel %vm698_vm3, %v1284_v38, %v695_v54 }
  0xe9   : > { %v704_v36 = vsel %vm701_vm4, %v703_v27, %v699_v56  ;;  %v719_v62 = vsel %vm718_vm7, %v1286_v39, %v715_v57 }
  0xea   : > { %v726_v58 = vmul.f32 %v704_v36, %v683_v53  ;;  %v724_v0 = vsel %vm721_vm8, %v723_v63, %v719_v62 }
  0xeb   : > { %v729_v1 = vsub.f32 1.0, %v724_v0  ;;  %v731_v5 = vmul.f32 %v724_v0, %v1694_v2 }
  0xec   : > { %v727_v61 = vadd.f32 %v726_v58, %v477_v55 }
  0xee   : > { %1287 = vtanh.f32 %v727_v61 }
  0xf4   : > { %v1288_v3 = vpop.eup %1287 }
  0xf5   : > { %v730_v4 = vmul.f32 %v1288_v3, %v729_v1 }
  0xf7   : > { %v732_v6 = vadd.f32 %v731_v5, %v730_v4 }
  0xf9   : > { %v734_v7 = vpack.c.bf16 %v732_v6, %v732_v6  ;;  %733 = vst [vmem:[#allocation7] sm:$0xff] %v732_v6 }
  0xfa   : > { %1234 = dma.vmem_to_hbm [thread:$0]  (%p224_p2), %s909_s30, 128, %s911_s11, [#allocation8]  }
  0xfb   : > { %845 = vmatmul.bf16.vlgmr.msra.gmra.mxu3 %v734_v7  ;;  %858 = vmatmul.bf16.vlgmr.msrb.gmra.mxu0 %v734_v7 }
 0x178   : > { %v859_v9 = vpop.f32.mrf.mxu0 }
 0x179   : > { %v860_v13 = vadd.f32 %v859_v9, %v754_v10 }
 0x17e   : > { %v846_v12 = vpop.f32.mrf.mxu3 }
 0x17f   : > { %v847_v14 = vadd.f32 %v846_v12, %v753_v11 }
 0x180   : > { %v861_v15 = vpop.f32.mrf.mxu0 }
 0x181   : > { %v863_v16 = vmax.f32 %v847_v14, %v860_v13 }
 0x183   : > { %864 = vmax.xlane.f32.xlu0 %v863_v16 }
 0x186   : > { %v848_v17 = vpop.f32.mrf.mxu3 }
 0x1f6   : > { %v865_v2 = vpop.xlane.xlu0 %864 }
 0x1f7   : > { %v866_v18 = vsub.f32 %v847_v14, %v865_v2  ;;  %v867_v19 = vsub.f32 %v860_v13, %v865_v2 }
 0x1f9   : > { %v868_v20 = vmul.f32 1.442695, %v866_v18  ;;  %v870_v21 = vmul.f32 1.442695, %v867_v19 }
 0x1fb   : > { %1289 = vpow2.f32 %v868_v20 }
 0x1fc   : > { %1291 = vpow2.f32 %v870_v21 }
 0x201   : > { %v1290_v22 = vpop.eup %1289 }
 0x202   : > { %v1292_v23 = vpop.eup %1291 }
 0x203   : > { %v872_v24 = vadd.f32 %v1292_v23, %v1290_v22 }
 0x205   : > { %873 = vadd.xlane.f32.xlu0 %v872_v24 }
 0x278   : > { %v874_v25 = vpop.xlane.xlu0 %873 }
 0x279   : > { %1293 = vlog2.f32 %v874_v25 }
 0x27f   : > { %v1294_v26 = vpop.eup %1293 }
 0x280   : > { %v876_v28 = vmul.f32 0.6931472, %v1294_v26 }
 0x282   : > { %v877_v29 = vadd.f32 %v876_v28, %v865_v2 }
 0x284   : > { %v878_v30 = vsub.f32 %v847_v14, %v877_v29  ;;  %v879_v31 = vsub.f32 %v860_v13, %v877_v29 }
 0x286   : > { %880 = vst [vmem:[%s1525_s15] sm:$0xff] %v878_v30 }
 0x287   : > { %881 = vst [vmem:[%s1525_s15 + $0x8] sm:$0xff] %v879_v31 }
 0x288   : > { %1362 = shalt.err (!%p1359_p7)
}
 0x289   : > { %1232 = dma.vmem_to_hbm [thread:$0]  (%p1505_p5), %s897_s24, 256, %s899_s13, %s883_s21  }
 0x28a   : > { %1382 = dma.done.wait (%p224_p2), [#allocation8], 128  }
 0x28b   : > { %1384 = vsyncadd (%p224_p2), [#allocation8], 4294967168 }
 0x28c PF: > { %s1969_s15 = sld [smem:[#allocation14_spill]] }
 0x28d   : > { %s1970_s30 = sld [smem:[#allocation12_spill]] }
 0x292   : > { %p1244_p8 = scmp.ge.s32.totalorder %s1969_s15, 2 }
 0x293   : > { %s927_s3 = sand.u32 1, %s1970_s30  }
 0x294   : > { %p1239_p9 = pnand %p1244_p8, %p1509_p6  ;;  %s928_s11 = scalar_lea.sflag [#allocation6], %s927_s3 }
 0x296   : > { %p1240_p10 = pneg %p1239_p9 }
 0x298   : > { %1386 = dma.done.wait (%p1240_p10), %s928_s11, 256  }
 0x299   : > { %1388 = vsyncadd (%p1240_p10), %s928_s11, 4294967040  ;;  %s1972_s20 = sld [smem:[#allocation15_spill]]  ;;  %s1975_s17 = smov %s1395_s18 }
 0x29a   : > { %s1973_s14 = sld [smem:[#allocation13_spill]] }
 0x29b   : > { %s1974_s19 = sld [smem:[#allocation16_spill]] }
 0x29f   : > { %p30_p5 = scmp.ge.s32.totalorder %s1972_s20, 14  }
 0x2a0   : > { %s1976_s18 = smov %s1973_s14 }
 0x2a1   :  { %32 = sbr.rel (!%p30_p5) target bundleno = 12 (0xc), region = 114 }
 0x2a6   :  { %934 = vsyncpa [#allocation6], 1 }
 0x2a7   :  { %936 = vsyncpa [#allocation6 + $0x1], 1 }
 0x2a8   :  { %937 = vsyncpa [#allocation8], 1 }

</bundles_post_ra>
